<compile_context>
chip_gen: v5e
topology: v5e:2x2
jax: 0.10.0
libtpu: 0.0.40
codegen_flags: <defaults>
</compile_context>

<pallas_src>
import jax
import jax.numpy as jnp
from jax.experimental import pallas as pl
from jax.experimental.pallas import tpu as pltpu

HIDDEN = 256  # matches torch.randn(256, 1) sentinel vector


def _ques_attn_kernel(x_ref, v_ref, o_ref):
    # x_ref: (TB, T, H) VMEM tile of batch rows (input dtype, possibly bf16)
    # v_ref: (1, H) lane-dense sentinel row (full array, f32)
    # o_ref: (TB, H) output tile (lane-dense, no size-1 sublane padding)
    x = x_ref[...].astype(jnp.float32)                     # (TB, T, H) f32
    v = v_ref[...]                                         # (1, H) f32

    # attention scores on the VPU: broadcast-multiply + lane reduce -> (TB, T)
    scores = jnp.sum(x * v, axis=-1)

    # numerically-stable softmax over the sequence axis T (per batch row)
    m = jnp.max(scores, axis=-1, keepdims=True)            # (TB, 1)
    p = jnp.exp(scores - m)                                # (TB, T) unnormalized weights
    denom = jnp.sum(p, axis=-1, keepdims=True)             # (TB, 1)

    # unnormalized weighted sum over T, then one exact scale by 1/denom
    weighted = jnp.sum(p[:, :, None] * x, axis=1)          # (TB, H)
    o_ref[...] = (weighted / denom).astype(o_ref.dtype)    # exact divide (free here)


def _vmem_caps():
    """(block-sizing budget, scoped vmem_limit_bytes) per TPU generation."""
    try:
        phys = pltpu.get_tpu_info().vmem_capacity_bytes
    except Exception:
        phys = 64 << 20  # conservative fallback (v7x per-TC VMEM)
    budget = min(int(phys * 0.5), 64 << 20)   # what we let the streamed blocks use
    limit = min(int(phys * 0.75), 96 << 20)   # scoped limit handed to Mosaic
    return budget, limit


def _choose_tb(B, T, H, in_itemsize, out_itemsize, vmem_budget):
    """Batch rows per grid step, sized so blocks + temporaries fit the VMEM budget."""
    # f32 elementwise temporaries: (x*v) and (p[:,:,None]*x); +1 upcast copy if not f32
    n_tmp = 2 + (0 if in_itemsize == 4 else 1)
    per_row = (2 * T * H * in_itemsize          # double-buffered input block
               + n_tmp * T * H * 4              # full-block f32 temporaries
               + 2 * H * out_itemsize)          # double-buffered output block
    tb = max(1, vmem_budget // per_row)
    if B <= 8:
        return int(min(tb, B)) if tb < B else B  # single/whole-batch block, full-dim legal
    # keep >= 4 grid steps for pipeline overlap and v7x megacore sharding
    tb = min(tb, B, 512, max(8, pl.cdiv(B, 4)))
    tb = max(8, (int(tb) // 8) * 8)              # sublane-aligned output blocks
    return int(tb)


def ques_attn(query_lstm_out: jax.Array, sentinel_vec: jax.Array, *, tb: int | None = None) -> jax.Array:
    """query_lstm_out: (B, T, H) f32 or bf16, sentinel_vec: (H, 1) -> (B, 1, H)."""
    B, T, H = query_lstm_out.shape
    assert sentinel_vec.shape == (H, 1)

    in_itemsize = jnp.dtype(query_lstm_out.dtype).itemsize
    out_dtype = query_lstm_out.dtype
    out_itemsize = jnp.dtype(out_dtype).itemsize

    vmem_budget, vmem_limit = _vmem_caps()
    if tb is None:
        tb = _choose_tb(B, T, H, in_itemsize, out_itemsize, vmem_budget)
    tb = int(max(1, min(tb, B)))

    # lane-dense f32 sentinel: (H, 1) -> (1, H)
    v_row = sentinel_vec.reshape(1, H).astype(jnp.float32)

    grid = (pl.cdiv(B, tb),)
    out2d = pl.pallas_call(
        _ques_attn_kernel,
        out_shape=jax.ShapeDtypeStruct((B, H), out_dtype),
        grid_spec=pltpu.PrefetchScalarGridSpec(
            num_scalar_prefetch=0,
            grid=grid,
            in_specs=[
                pl.BlockSpec((tb, T, H), lambda b: (b, 0, 0)),   # tb batch rows per step
                pl.BlockSpec((1, H), lambda b: (0, 0)),          # sentinel row, resident
            ],
            out_specs=pl.BlockSpec((tb, H), lambda b: (b, 0)),   # dense 2-D output block
        ),
        compiler_params=pltpu.CompilerParams(
            dimension_semantics=("parallel",),   # batch axis shards across TCs on v7x
            vmem_limit_bytes=vmem_limit,
        ),
    )(query_lstm_out, v_row)

    return out2d.reshape(B, 1, H)


def _reference(query_lstm_out, sentinel_vec):
    # pure-JAX reference mirroring the PyTorch forward
    attn = jnp.matmul(query_lstm_out, sentinel_vec)                 # (B, T, 1)
    attn_wts = jax.nn.softmax(attn, axis=1)                         # softmax over T
    return jnp.matmul(jnp.transpose(attn_wts, (0, 2, 1)),           # (B, 1, T)
                      query_lstm_out)                               # -> (B, 1, H)


if __name__ == "__main__":
    key = jax.random.PRNGKey(0)
    k_x, k_v = jax.random.split(key)

    B, T, H = 2, 8, HIDDEN
    x = jax.random.normal(k_x, (B, T, H), dtype=jnp.float32)        # query_lstm_out
    # deterministic in-script parameter init (torch.randn(256, 1) analogue)
    sentinel_vec = jax.random.normal(k_v, (H, 1), dtype=jnp.float32)

    out = ques_attn(x, sentinel_vec)
    out = jax.block_until_ready(out)

    ref = _reference(x, sentinel_vec)
    assert out.shape == (B, 1, H), out.shape
    assert jnp.allclose(out, ref, atol=1e-4, rtol=1e-4), "mismatch vs reference"

    print("KERNEL_OK")
</pallas_src>

<mosaic_0001>
module attributes {stable_mosaic.version = 11 : i64} {
  func.func @_ques_attn_kernel(%arg0: i32, %arg1: memref<2x8x256xf32, #tpu.memory_space<vmem>>, %arg2: memref<1x256xf32, #tpu.memory_space<vmem>>, %arg3: memref<2x256xf32, #tpu.memory_space<vmem>>) attributes {dimension_semantics = [#tpu.dimension_semantics<parallel>], iteration_bounds = array<i64: 1>, scalar_prefetch = 0 : i64, scratch_operands = 0 : i64, tpu.core_type = #tpu.core_type<tc>, window_params = [{transform_indices = @transform_0, window_bounds = array<i64: 2, 8, 256>}, {pipeline_mode = #tpu.pipeline_mode<synchronous>, transform_indices = @transform_1, window_bounds = array<i64: 1, 256>}, {transform_indices = @transform_2, window_bounds = array<i64: 2, 256>}]} {
    %c0 = arith.constant 0 : index
    %c0_0 = arith.constant 0 : index
    %c0_1 = arith.constant 0 : index
    %0 = vector.load %arg1[%c0, %c0_0, %c0_1] : memref<2x8x256xf32, #tpu.memory_space<vmem>>, vector<2x8x256xf32>
    %c0_2 = arith.constant 0 : index
    %c0_3 = arith.constant 0 : index
    %1 = vector.load %arg2[%c0_2, %c0_3] : memref<1x256xf32, #tpu.memory_space<vmem>>, vector<1x256xf32>
    %2 = vector.shape_cast %1 : vector<1x256xf32> to vector<1x1x256xf32>
    %3 = vector.broadcast %2 : vector<1x1x256xf32> to vector<2x8x256xf32>
    %4 = arith.mulf %0, %3 : vector<2x8x256xf32>
    %cst = arith.constant dense<0.000000e+00> : vector<2x8xf32>
    %5 = vector.multi_reduction <add>, %4, %cst [2] : vector<2x8x256xf32> to vector<2x8xf32>
    %cst_4 = arith.constant dense<0xFF800000> : vector<2xf32>
    %6 = vector.multi_reduction <maximumf>, %5, %cst_4 [1] : vector<2x8xf32> to vector<2xf32>
    %7 = vector.shape_cast %6 : vector<2xf32> to vector<2x1xf32>
    %8 = vector.broadcast %7 : vector<2x1xf32> to vector<2x8xf32>
    %9 = arith.subf %5, %8 : vector<2x8xf32>
    %10 = math.exp %9 : vector<2x8xf32>
    %cst_5 = arith.constant dense<0.000000e+00> : vector<2xf32>
    %11 = vector.multi_reduction <add>, %10, %cst_5 [1] : vector<2x8xf32> to vector<2xf32>
    %12 = vector.shape_cast %11 : vector<2xf32> to vector<2x1xf32>
    %13 = vector.shape_cast %10 : vector<2x8xf32> to vector<2x8x1xf32>
    %14 = vector.broadcast %13 : vector<2x8x1xf32> to vector<2x8x256xf32>
    %15 = arith.mulf %14, %0 : vector<2x8x256xf32>
    %cst_6 = arith.constant dense<0.000000e+00> : vector<2x256xf32>
    %16 = vector.multi_reduction <add>, %15, %cst_6 [1] : vector<2x8x256xf32> to vector<2x256xf32>
    %17 = vector.broadcast %12 : vector<2x1xf32> to vector<2x256xf32>
    %18 = arith.divf %16, %17 : vector<2x256xf32>
    %c0_7 = arith.constant 0 : index
    %c0_8 = arith.constant 0 : index
    %19 = vector.load %arg3[%c0_7, %c0_8] : memref<2x256xf32, #tpu.memory_space<vmem>>, vector<2x256xf32>
    tpu.vector_store %arg3[%c0_7, %c0_8], %18 {strides = array<i32>} : memref<2x256xf32, #tpu.memory_space<vmem>>, vector<2x256xf32>,
    return
  }
  func.func @transform_0(%arg0: i32) -> (i32, i32, i32) {
    %c0_i32 = arith.constant 0 : i32
    %c0_i32_0 = arith.constant 0 : i32
    %c0_i32_1 = arith.constant 0 : i32
    return %arg0, %c0_i32, %c0_i32_0 : i32, i32, i32
  }
  func.func @transform_1(%arg0: i32) -> (i32, i32) {
    %c0_i32 = arith.constant 0 : i32
    %c0_i32_0 = arith.constant 0 : i32
    %c0_i32_1 = arith.constant 0 : i32
    return %c0_i32, %c0_i32_0 : i32, i32
  }
  func.func @transform_2(%arg0: i32) -> (i32, i32) {
    %c0_i32 = arith.constant 0 : i32
    %c0_i32_0 = arith.constant 0 : i32
    return %arg0, %c0_i32 : i32, i32
  }
}

</mosaic_0001>

<bundles_post_ra>
// kernel: tpu_custom_call.1
= control target key start
LH: loop header
LB: loop body
LE: loop exit
PB: predicated region body
PF: predicated region fallthrough
CT: control target
= control target key end

     0   :  { %7 = vsyncpa [#allocation3], 0  ;;  %s338_s0 = inlined_call_operand.hbm [shape: f32[2,8,256], index: 0, kind: input, shape index: {}]   ;;  %s339_s1 = inlined_call_operand.hbm [shape: f32[1,256], index: 1, kind: input, shape index: {}]   ;;  %s340_s2 = inlined_call_operand.hbm [shape: f32[2,256], index: 2, kind: output, shape index: {}]  }
   0x1   :  { %8 = vsyncpa [#allocation6], 0 }
   0x2   :  { %9 = vsyncpa [#allocation4], 0  ;;  %s14_s11 = sshll.u32 %s338_s0, 4  ;;  %s303_s12 = smov [#allocation2]   ;;  %s15_s11 = int_to_ptr.hbm [resolvable:$true] %s14_s11 }
   0x3   :  { %s16_s13 = sshll.u32 %s303_s12, 4  ;;  %s28_s16 = sshll.u32 %s339_s1, 4  ;;  %s17_s13 = int_to_ptr.vmem [resolvable:$true] %s16_s13  ;;  %s29_s16 = int_to_ptr.hbm [resolvable:$true] %s28_s16 }
   0x4   :  { %s304_s17 = smov 256   ;;  %s305_s18 = smov 16  }
   0x5   :  { %22 = dma.hbm_to_vmem [thread:$0]  %s15_s11, 512, %s17_s13, [#allocation3], %s304_s17, %s304_s17, %s305_s18  }
   0x6   :  { %s306_s19 = smov [#allocation5]  }
   0x7   :  { %s30_s20 = sshll.u32 %s306_s19, 4  ;;  %s31_s20 = int_to_ptr.vmem [resolvable:$true] %s30_s20 }
   0x8   :  { %33 = dma.hbm_to_vmem [thread:$0]  %s29_s16, 32, %s31_s20, [#allocation6]  }
   0x9   :  { %297 = dma.done.wait [#allocation3], 512  }
   0xa   :  { %298 = vsyncadd [#allocation3], 4294966784 }
   0xb   :  { %299 = dma.done.wait [#allocation6], 32  }
   0xc   :  { %300 = vsyncadd [#allocation6], 4294967264  ;;  %v42_v0 = vld [vmem:[#allocation2] sm:$0xff]  ;;  %v43_v1 = vld [vmem:[#allocation2 + $0x8] sm:$0xff]  ;;  %v64_v14 = vlaneseq  ;;  %vm68_vm0 = vcmask 1041409   ;;  %vm71_vm1 = vcmask 58368  }
   0xd   :  { %v46_v2 = vld [vmem:[#allocation5] sm:$0x3]  ;;  %v44_v7 = vld [vmem:[#allocation2 + $0x10] sm:$0xff]  ;;  %v45_v8 = vld [vmem:[#allocation2 + $0x18] sm:$0xff]  ;;  %v307_v21 = vmov 0   ;;  %vm173_vm10 = vcmask 1041408  }
   0xe   :  { %v48_v3 = vperm.slane %v46_v2, 0  ;;  %v49_v4 = vperm.slane %v46_v2, 1  ;;  %v65_v15 = vand.u32 127, %v64_v14  ;;  %215 = vset.pattern.permute.xlu2 %v307_v21  ;;  %214 = vset.pattern.permute.xlu1 %v307_v21  ;;  %vm182_vm11 = vcmask 1043459   ;;  %s308_s0 = smov [#allocation7]   ;;  %s197_s23 = sshll.u32 %s340_s2, 4  ;;  %s198_s23 = int_to_ptr.hbm [resolvable:$true] %s197_s23 }
   0xf   :  { %216 = vset.pattern.permute.xlu0 %v307_v21  ;;  %vm184_vm12 = vcmask 1045509   ;;  %s195_s1 = sshll.u32 %s308_s0, 4  ;;  %vm186_vm13 = vcmask 1047559   ;;  %s196_s1 = int_to_ptr.vmem [resolvable:$true] %s195_s1 }
  0x10   :  { %v52_v5 = vmul.f32 %v48_v3, %v42_v0  ;;  %v53_v6 = vmul.f32 %v49_v4, %v43_v1  ;;  %v54_v10 = vmul.f32 %v48_v3, %v44_v7  ;;  %v55_v11 = vmul.f32 %v49_v4, %v45_v8 }
  0x12   :  { %v56_v9 = vadd.f32 %v53_v6, %v52_v5  ;;  %v59_v12 = vadd.f32 %v55_v11, %v54_v10 }
  0x14   :  { %57 = vadd.xlane.f32.xlu0 %v56_v9 }
  0x1c   :  { %60 = vadd.xlane.f32.xlu0 %v59_v12 }
  0x87   :  { %v58_v13 = vpop.xlane.xlu0 %57 }
  0x88   :  { %v66_v17 = vperm.slane %v58_v13, %v65_v15 }
  0x8f   :  { %v61_v16 = vpop.xlane.xlu0 %60 }
  0x90   :  { %v67_v18 = vperm.slane %v61_v16, %v65_v15 }
  0x92   :  { %v69_v19 = vsel %vm68_vm0, %v67_v18, %v66_v17 }
  0x93   :  { %v72_v20 = vsel %vm71_vm1, %v69_v19, -inf }
  0x94   :  { %73 = vmax.xlane.f32.xlu1 %v72_v20 }
 0x107   :  { %v74_v22 = vpop.xlane.xlu1 %73 }
 0x108   :  { %v76_v23 = vperm.slane %v74_v22, 0  ;;  %v77_v24 = vperm.slane %v74_v22, 1 }
 0x10a   :  { %v80_v25 = vsub.f32 %v58_v13, %v76_v23  ;;  %v81_v26 = vsub.f32 %v61_v16, %v77_v24 }
 0x10c   :  { %v82_v27 = vmul.f32 1.442695, %v80_v25  ;;  %v84_v28 = vmul.f32 1.442695, %v81_v26 }
 0x10e   :  { %217 = vpow2.f32 %v82_v27 }
 0x10f   :  { %219 = vpow2.f32 %v84_v28 }
 0x114   :  { %v218_v29 = vpop.eup %217 }
 0x115   :  { %v220_v30 = vpop.eup %219  ;;  %89 = vperm.xlu1 %214, %v218_v29  }
 0x116   :  { %92 = vperm.xlu2 %215, %v220_v30  }
 0x170   :  { %v93_v31 = vpop.permute.xlu2 %92 }
 0x171   :  { %v95_v33 = vperm.slane %v93_v31, %v65_v15  ;;  %v106_v38 = vmul.f32 %v93_v31, %v45_v8  ;;  %v105_v39 = vmul.f32 %v93_v31, %v44_v7 }
 0x173   :  { %v125_v41 = vrot.slane %v106_v38, 4  ;;  %v119_v43 = vrot.slane %v105_v39, 4 }
 0x175   :  { %v126_v46 = vadd.f32 %v125_v41, %v106_v38  ;;  %v120_v49 = vadd.f32 %v119_v43, %v105_v39 }
 0x177   :  { %v127_v51 = vrot.slane %v126_v46, 2  ;;  %v121_v54 = vrot.slane %v120_v49, 2 }
 0x179   :  { %v128_v58 = vadd.f32 %v127_v51, %v126_v46  ;;  %v122_v62 = vadd.f32 %v121_v54, %v120_v49 }
 0x17b   :  { %v129_v4 = vrot.slane %v128_v58, 1  ;;  %v123_v10 = vrot.slane %v122_v62, 1 }
 0x17d   :  { %v124_v22 = vadd.f32 %v123_v10, %v122_v62 }
 0x187   :  { %v90_v32 = vpop.permute.xlu1 %89 }
 0x188   :  { %v94_v34 = vperm.slane %v90_v32, %v65_v15  ;;  %v104_v37 = vmul.f32 %v90_v32, %v43_v1  ;;  %v103_v42 = vmul.f32 %v90_v32, %v42_v0  ;;  %v130_v15 = vadd.f32 %v129_v4, %v128_v58 }
 0x18a   :  { %v96_v35 = vsel %vm68_vm0, %v95_v33, %v94_v34  ;;  %v113_v40 = vrot.slane %v104_v37, 4  ;;  %v107_v47 = vrot.slane %v103_v42, 4 }
 0x18b   :  { %v98_v36 = vsel %vm71_vm1, %v96_v35, 0.0 }
 0x18c   :  { %99 = vadd.xlane.f32.xlu2 %v98_v36  ;;  %v114_v44 = vadd.f32 %v113_v40, %v104_v37  ;;  %v108_v52 = vadd.f32 %v107_v47, %v103_v42 }
 0x18e   :  { %v115_v50 = vrot.slane %v114_v44, 2  ;;  %v109_v59 = vrot.slane %v108_v52, 2 }
 0x190   :  { %v116_v55 = vadd.f32 %v115_v50, %v114_v44  ;;  %v110_v5 = vadd.f32 %v109_v59, %v108_v52 }
 0x192   :  { %v117_v63 = vrot.slane %v116_v55, 1  ;;  %v111_v18 = vrot.slane %v110_v5, 1 }
 0x194   :  { %v118_v11 = vadd.f32 %v117_v63, %v116_v55  ;;  %v112_v24 = vadd.f32 %v111_v18, %v110_v5 }
 0x1ff   :  { %v100_v45 = vpop.xlane.xlu2 %99 }
 0x200   :  { %v132_v48 = vrot.slane %v100_v45, 1  ;;  %221 = vrcp.f32 %v100_v45  ;;  %v146_v0 = vand.u32 2147483648, %v100_v45  ;;  %v144_v2 = vand.u32 2147483647, %v100_v45 }
 0x201   :  { %vm140_vm3 = vweird.f32 %v100_v45 }
 0x202   :  { %223 = vrcp.f32 %v132_v48  ;;  %v162_v6 = vand.u32 2147483648, %v132_v48  ;;  %v160_v9 = vand.u32 2147483647, %v132_v48  ;;  %v147_v12 = vor.u32 1.1754944e-38, %v146_v0 }
 0x203   :  { %vm145_vm6 = vcmp.eq.f32.partialorder %v144_v2, 8.507059e+37  ;;  %vm156_vm7 = vweird.f32 %v132_v48 }
 0x204   :  { %v163_v17 = vor.u32 1.1754944e-38, %v162_v6  ;;  %vm161_vm9 = vcmp.eq.f32.partialorder %v160_v9, 8.507059e+37 }
 0x206   :  { %v222_v53 = vpop.eup %221 }
 0x207   :  { %v136_v56 = vmul.f32 %v222_v53, %v100_v45  ;;  %vm141_vm2 = vweird.f32 %v222_v53 }
 0x208   :  { %v224_v57 = vpop.eup %223  ;;  %vm142_vm5 = vmor %vm140_vm3, %vm141_vm2 }
 0x209   :  { %v137_v60 = vsub.f32 1.0, %v136_v56  ;;  %v152_v61 = vmul.f32 %v224_v57, %v132_v48  ;;  %vm157_vm4 = vweird.f32 %v224_v57 }
 0x20a   :  { %vm158_vm8 = vmor %vm156_vm7, %vm157_vm4 }
 0x20b   :  { %v138_v1 = vmul.f32 %v222_v53, %v137_v60  ;;  %v153_v3 = vsub.f32 1.0, %v152_v61 }
 0x20d   :  { %v139_v7 = vadd.f32 %v222_v53, %v138_v1  ;;  %v154_v8 = vmul.f32 %v224_v57, %v153_v3 }
 0x20f   :  { %v143_v13 = vsel %vm142_vm5, %v222_v53, %v139_v7  ;;  %v155_v14 = vadd.f32 %v224_v57, %v154_v8 }
 0x210   :  { %v148_v16 = vsel %vm145_vm6, %v147_v12, %v143_v13 }
 0x211   :  { %v150_v19 = vmul.f32 %v148_v16, %v118_v11  ;;  %v159_v20 = vsel %vm158_vm8, %v224_v57, %v155_v14  ;;  %v149_v28 = vmul.f32 %v148_v16, %v112_v24 }
 0x212   :  { %v164_v21 = vsel %vm161_vm9, %v163_v17, %v159_v20 }
 0x213   :  { %v166_v23 = vmul.f32 %v164_v21, %v130_v15  ;;  %v171_v25 = vrot.slane %v150_v19, 6  ;;  %v165_v26 = vmul.f32 %v164_v21, %v124_v22 }
 0x215   :  { %v172_v27 = vrot.slane %v166_v23, 6  ;;  %v174_v31 = vsel %vm173_vm10, %v149_v28, %v171_v25 }
 0x217   :  { %v175_v29 = vsel %vm173_vm10, %v165_v26, %v172_v27 }
 0x218   :  { %v180_v30 = vrot.slane %v175_v29, 7 }
 0x21a   :  { %v181_v32 = vsel %vm68_vm0, %v180_v30, %v174_v31 }
 0x21b   :  { %v183_v33 = vsel %vm182_vm11, %v180_v30, %v181_v32 }
 0x21c   :  { %v185_v34 = vsel %vm184_vm12, %v180_v30, %v183_v33 }
 0x21d   :  { %v187_v35 = vsel %vm186_vm13, %v180_v30, %v185_v34 }
 0x21e   :  { %189 = vst [vmem:[#allocation7] sm:$0xf] %v187_v35 }
 0x21f   :  { %200 = dma.vmem_to_hbm [thread:$0]  %s196_s1, 64, %s198_s23, [#allocation4]  }
 0x220   :  { %301 = dma.done.wait [#allocation4], 64  }
 0x221   :  { %302 = vsyncadd [#allocation4], 4294967232 }
 0x222   :  { %205 = vsyncpa [#allocation3], 1 }
 0x223   :  { %206 = vsyncpa [#allocation6], 1 }
 0x224   :  { %207 = vsyncpa [#allocation4], 1 }

</bundles_post_ra>
